<compile_context>
chip_gen: v6e
topology: v6e:2x2x1
jax: 0.10.0
libtpu: 0.0.40
codegen_flags: <defaults>
</compile_context>

<pallas_src>
import jax
import jax.numpy as jnp
from jax import lax
from jax.experimental import pallas as pl
from jax.experimental.pallas import tpu as pltpu

BN_EPS = 1e-5
LRELU_SLOPE = 0.2

# Tile ceilings.  Worst case VMEM (double-buffered bf16 inputs + f32 acc) is a
# few MiB, well inside the default scoped limits of v5e (16 MiB), v6e/v7x (32).
MAX_TM = 512      # output-row tile
MAX_TK = 1024     # contraction tile
TN = 128          # lane-dense output-channel tile (v5e MXU-native width)


def _round_up(x, m):
    return ((x + m - 1) // m) * m


def _pick_tile(dim, max_tile, align):
    """Return (tile, padded_dim): tile is a multiple of `align` and divides padded_dim."""
    padded = _round_up(max(dim, 1), align)
    if padded <= max_tile:
        return padded, padded
    return max_tile, _round_up(dim, max_tile)


# ---------------------------------------------------------------------------
# Pallas kernels
# ---------------------------------------------------------------------------
def _matmul_kernel(p_ref, w_ref, o_ref, acc_ref):
    """Tiled conv-as-matmul: (TM,TK)@(TK,TN) with K-axis accumulation."""
    @pl.when(pl.program_id(2) == 0)
    def _():
        acc_ref[...] = jnp.zeros_like(acc_ref)

    acc_ref[...] += jnp.dot(p_ref[...], w_ref[...],
                            preferred_element_type=jnp.float32)

    @pl.when(pl.program_id(2) == pl.num_programs(2) - 1)
    def _():
        o_ref[...] = acc_ref[...].astype(o_ref.dtype)


def _matmul_stats_kernel(p_ref, w_ref, y_ref, sum_ref, sq_ref, acc_ref):
    """Tiled conv matmul + per-channel sum / sum-of-squares accumulation.

    Grid order is (Cout-tile j, M-tile i, K-tile k) so the (1, TN) stats block
    for a given j stays resident in VMEM across all (i, k) steps.
    """
    i = pl.program_id(1)   # M tile  (reduction axis for the stats outputs)
    k = pl.program_id(2)   # K tile  (matmul reduction)

    @pl.when(k == 0)
    def _():
        acc_ref[...] = jnp.zeros_like(acc_ref)

    acc_ref[...] += jnp.dot(p_ref[...], w_ref[...],
                            preferred_element_type=jnp.float32)

    @pl.when(jnp.logical_and(i == 0, k == 0))
    def _():
        sum_ref[...] = jnp.zeros_like(sum_ref)
        sq_ref[...] = jnp.zeros_like(sq_ref)

    @pl.when(k == pl.num_programs(2) - 1)
    def _():
        y = acc_ref[...]
        y_ref[...] = y.astype(y_ref.dtype)
        sum_ref[...] += jnp.sum(y, axis=0, keepdims=True)
        sq_ref[...] += jnp.sum(y * y, axis=0, keepdims=True)


def _bn_lrelu_kernel(y_ref, scale_ref, shift_ref, o_ref):
    """Element-wise BatchNorm apply (pre-folded scale/shift) + LeakyReLU."""
    z = y_ref[...].astype(jnp.float32) * scale_ref[...] + shift_ref[...]
    o_ref[...] = jnp.where(z > 0, z, LRELU_SLOPE * z).astype(o_ref.dtype)


# ---------------------------------------------------------------------------
# pallas_call wrappers
# ---------------------------------------------------------------------------
def pallas_conv_matmul(patches, w2d, out_dtype):
    """Plain conv (no BN / activation).  Returns (M, Cout) in out_dtype."""
    M, K = patches.shape
    _, Cout = w2d.shape
    TM, M_pad = _pick_tile(M, MAX_TM, 8)
    TK, K_pad = _pick_tile(K, MAX_TK, 128)
    C_pad = _round_up(Cout, TN)

    p = jnp.pad(patches.astype(jnp.bfloat16), ((0, M_pad - M), (0, K_pad - K)))
    w = jnp.pad(w2d.astype(jnp.bfloat16), ((0, K_pad - K), (0, C_pad - Cout)))

    grid = (M_pad // TM, C_pad // TN, K_pad // TK)
    y = pl.pallas_call(
        _matmul_kernel,
        out_shape=jax.ShapeDtypeStruct((M_pad, C_pad), out_dtype),
        grid_spec=pltpu.PrefetchScalarGridSpec(
            num_scalar_prefetch=0,
            grid=grid,
            in_specs=[pl.BlockSpec((TM, TK), lambda i, j, k: (i, k)),
                      pl.BlockSpec((TK, TN), lambda i, j, k: (k, j))],
            out_specs=pl.BlockSpec((TM, TN), lambda i, j, k: (i, j)),
            scratch_shapes=[pltpu.VMEM((TM, TN), jnp.float32)]),
        compiler_params=pltpu.CompilerParams(
            dimension_semantics=("parallel", "parallel", "arbitrary")),
    )(p, w)
    return y[:M, :Cout]


def pallas_conv_bn_lrelu(patches, w2d, gamma, beta, out_dtype=jnp.bfloat16):
    """Conv + BatchNorm(batch stats) + LeakyReLU(0.2).  Returns (M, Cout)."""
    M, K = patches.shape
    _, Cout = w2d.shape
    TM, M_pad = _pick_tile(M, MAX_TM, 8)
    TK, K_pad = _pick_tile(K, MAX_TK, 128)
    C_pad = _round_up(Cout, TN)

    p = jnp.pad(patches.astype(jnp.bfloat16), ((0, M_pad - M), (0, K_pad - K)))
    w = jnp.pad(w2d.astype(jnp.bfloat16), ((0, K_pad - K), (0, C_pad - Cout)))

    # Pass 1: tiled matmul + per-channel sum / sum-of-squares (f32 accumulators).
    # Zero-padded rows/columns contribute nothing to the statistics.
    grid = (C_pad // TN, M_pad // TM, K_pad // TK)   # (j, i, k)
    y, s, sq = pl.pallas_call(
        _matmul_stats_kernel,
        out_shape=(jax.ShapeDtypeStruct((M_pad, C_pad), jnp.bfloat16),
                   jax.ShapeDtypeStruct((1, C_pad), jnp.float32),
                   jax.ShapeDtypeStruct((1, C_pad), jnp.float32)),
        grid_spec=pltpu.PrefetchScalarGridSpec(
            num_scalar_prefetch=0,
            grid=grid,
            in_specs=[pl.BlockSpec((TM, TK), lambda j, i, k: (i, k)),
                      pl.BlockSpec((TK, TN), lambda j, i, k: (k, j))],
            out_specs=(pl.BlockSpec((TM, TN), lambda j, i, k: (i, j)),
                       pl.BlockSpec((1, TN), lambda j, i, k: (0, j)),
                       pl.BlockSpec((1, TN), lambda j, i, k: (0, j))),
            scratch_shapes=[pltpu.VMEM((TM, TN), jnp.float32)]),
        compiler_params=pltpu.CompilerParams(
            dimension_semantics=("parallel", "arbitrary", "arbitrary")),
    )(p, w)

    # Tiny (1, C) glue: fold batch stats + affine into one scale/shift pair.
    mean = s / M                                         # true M (padding is zeros)
    var = jnp.maximum(sq / M - mean * mean, 0.0)         # biased variance
    inv_std = lax.rsqrt(var + BN_EPS)
    g = jnp.pad(gamma.astype(jnp.float32), ((0, 0), (0, C_pad - Cout)))
    b = jnp.pad(beta.astype(jnp.float32), ((0, 0), (0, C_pad - Cout)))
    scale = g * inv_std
    shift = b - mean * scale

    # Pass 2: lane-dense element-wise normalize + LeakyReLU.
    grid2 = (M_pad // TM, C_pad // TN)
    out = pl.pallas_call(
        _bn_lrelu_kernel,
        out_shape=jax.ShapeDtypeStruct((M_pad, C_pad), out_dtype),
        grid_spec=pltpu.PrefetchScalarGridSpec(
            num_scalar_prefetch=0,
            grid=grid2,
            in_specs=[pl.BlockSpec((TM, TN), lambda i, j: (i, j)),
                      pl.BlockSpec((1, TN), lambda i, j: (0, j)),
                      pl.BlockSpec((1, TN), lambda i, j: (0, j))],
            out_specs=pl.BlockSpec((TM, TN), lambda i, j: (i, j))),
        compiler_params=pltpu.CompilerParams(
            dimension_semantics=("parallel", "parallel")),
    )(y, scale, shift)
    return out[:M, :Cout]


# ---------------------------------------------------------------------------
# Glue: im2col (NHWC, bf16), parameter construction, forward loop
# ---------------------------------------------------------------------------
def im2col(x_nhwc, k=4, stride=2, pad=1):
    N, H, W, C = x_nhwc.shape
    xp = jnp.pad(x_nhwc, ((0, 0), (pad, pad), (pad, pad), (0, 0)))
    Ho = (H + 2 * pad - k) // stride + 1
    Wo = (W + 2 * pad - k) // stride + 1
    cols = []
    for di in range(k):
        for dj in range(k):
            patch = lax.slice(
                xp,
                (0, di, dj, 0),
                (N, di + stride * (Ho - 1) + 1, dj + stride * (Wo - 1) + 1, C),
                (1, stride, stride, 1),
            )  # (N, Ho, Wo, C)
            cols.append(patch)
    # (N, Ho, Wo, k*k, C)  ->  flattened K order is (kh, kw, cin)
    patches = jnp.stack(cols, axis=3)
    return patches.reshape(N * Ho * Wo, k * k * C), Ho, Wo


def _conv_weight(key, cin, cout):
    # nn.init.normal_(w, 0.0, 0.02); stored directly as (kh, kw, cin, cout)
    return 0.02 * jax.random.normal(key, (4, 4, cin, cout), jnp.float32)


def build_discriminator_params(key, n_blocks, in_ch, hid_ch):
    """Mirrors Discriminator.__init__ layer construction."""
    layers = []
    key, sub = jax.random.split(key)
    layers.append(dict(kind="conv", w=_conv_weight(sub, in_ch, hid_ch), stride=2))
    cur_ch = hid_ch
    i = 1
    for i in range(1, n_blocks):
        out_ch = min(2 ** i, 8) * hid_ch
        key, kw, kg = jax.random.split(key, 3)
        layers.append(dict(
            kind="block",
            w=_conv_weight(kw, cur_ch, out_ch),
            gamma=1.0 + 0.02 * jax.random.normal(kg, (1, out_ch), jnp.float32),
            beta=jnp.zeros((1, out_ch), jnp.float32),
            stride=2,
        ))
        cur_ch = out_ch
    out_ch = min(2 ** i, 8) * hid_ch
    key, kw, kg = jax.random.split(key, 3)
    layers.append(dict(
        kind="block",
        w=_conv_weight(kw, cur_ch, out_ch),
        gamma=1.0 + 0.02 * jax.random.normal(kg, (1, out_ch), jnp.float32),
        beta=jnp.zeros((1, out_ch), jnp.float32),
        stride=1,
    ))
    key, kw = jax.random.split(key)
    layers.append(dict(kind="conv", w=_conv_weight(kw, cur_ch, 1), stride=1))
    return layers


def discriminator_forward(x_nchw, layers):
    # NHWC, bf16 inter-layer activations (halves HBM traffic of im2col reads).
    x = jnp.transpose(x_nchw, (0, 2, 3, 1)).astype(jnp.bfloat16)
    n_layers = len(layers)
    for li, layer in enumerate(layers):
        N = x.shape[0]
        patches, Ho, Wo = im2col(x, k=4, stride=layer["stride"], pad=1)
        w2d = layer["w"].reshape(-1, layer["w"].shape[-1])   # (kh*kw*cin, cout)
        cout = w2d.shape[-1]
        if layer["kind"] == "conv":
            out_dtype = jnp.float32 if li == n_layers - 1 else jnp.bfloat16
            y = pallas_conv_matmul(patches, w2d, out_dtype)
        else:
            y = pallas_conv_bn_lrelu(patches, w2d, layer["gamma"], layer["beta"])
        x = y.reshape(N, Ho, Wo, cout)
    return jnp.transpose(x, (0, 3, 1, 2)).astype(jnp.float32)   # back to NCHW


# ---------------------------------------------------------------------------
if __name__ == "__main__":
    # Small, deterministic configuration.
    N_BLOCKS, IN_CH, HID_CH = 2, 4, 8
    BATCH, SPATIAL = 2, 16

    key = jax.random.PRNGKey(0)
    key, kx, kp = jax.random.split(key, 3)
    x = jax.random.normal(kx, (BATCH, IN_CH, SPATIAL, SPATIAL), jnp.float32)
    params = build_discriminator_params(kp, N_BLOCKS, IN_CH, HID_CH)

    fwd = jax.jit(lambda inp: discriminator_forward(inp, params))
    out = jax.block_until_ready(fwd(x))

    # Discriminator(2, 4, 8) on 16x16 input -> (N, 1, 2, 2)
    assert out.shape == (BATCH, 1, 2, 2), out.shape
    assert jnp.all(jnp.isfinite(out))
    print("KERNEL_OK")
</pallas_src>

<mosaic_0001>
module attributes {stable_mosaic.version = 11 : i64} {
  func.func @_matmul_kernel(%arg0: i32, %arg1: i32, %arg2: i32, %arg3: memref<128x128xbf16, #tpu.memory_space<vmem>>, %arg4: memref<128x128xbf16, #tpu.memory_space<vmem>>, %arg5: memref<128x128xbf16, #tpu.memory_space<vmem>>, %arg6: memref<128x128xf32, #tpu.memory_space<vmem>>) attributes {dimension_semantics = [#tpu.dimension_semantics<parallel>, #tpu.dimension_semantics<parallel>, #tpu.dimension_semantics<arbitrary>], iteration_bounds = array<i64: 1, 1, 1>, scalar_prefetch = 0 : i64, scratch_operands = 1 : i64, tpu.core_type = #tpu.core_type<tc>, window_params = [{transform_indices = @transform_0, window_bounds = array<i64: 128, 128>}, {transform_indices = @transform_1, window_bounds = array<i64: 128, 128>}, {transform_indices = @transform_2, window_bounds = array<i64: 128, 128>}]} {
    %c0_i32 = arith.constant 0 : i32
    %0 = arith.cmpi eq, %arg2, %c0_i32 : i32
    %1 = arith.extui %0 : i1 to i32
    %c0_i32_0 = arith.constant 0 : i32
    %2 = arith.cmpi ne, %1, %c0_i32_0 : i32
    scf.if %2 {
      %cst_10 = arith.constant 0.000000e+00 : f32
      %12 = vector.broadcast %cst_10 : f32 to vector<128x128xf32>
      %c0_11 = arith.constant 0 : index
      %c0_12 = arith.constant 0 : index
      %13 = vector.load %arg6[%c0_11, %c0_12] : memref<128x128xf32, #tpu.memory_space<vmem>>, vector<128x128xf32>
      tpu.vector_store %arg6[%c0_11, %c0_12], %12 {strides = array<i32>} : memref<128x128xf32, #tpu.memory_space<vmem>>, vector<128x128xf32>,
    } else {
    }
    %c0 = arith.constant 0 : index
    %c0_1 = arith.constant 0 : index
    %3 = vector.load %arg6[%c0, %c0_1] : memref<128x128xf32, #tpu.memory_space<vmem>>, vector<128x128xf32>
    %c0_2 = arith.constant 0 : index
    %c0_3 = arith.constant 0 : index
    %4 = vector.load %arg3[%c0_2, %c0_3] : memref<128x128xbf16, #tpu.memory_space<vmem>>, vector<128x128xbf16>
    %c0_4 = arith.constant 0 : index
    %c0_5 = arith.constant 0 : index
    %5 = vector.load %arg4[%c0_4, %c0_5] : memref<128x128xbf16, #tpu.memory_space<vmem>>, vector<128x128xbf16>
    %cst = arith.constant dense<0.000000e+00> : vector<128x128xf32>
    %6 = tpu.matmul %4, %5, %cst {dimension_numbers = #tpu.dot_dimension_numbers<[1], [0], [0], [1], [0, 0, 1, 1], [], []>} : vector<128x128xbf16>, vector<128x128xbf16>, vector<128x128xf32> -> vector<128x128xf32>
    %7 = arith.addf %3, %6 : vector<128x128xf32>
    %c0_6 = arith.constant 0 : index
    %c0_7 = arith.constant 0 : index
    %8 = vector.load %arg6[%c0_6, %c0_7] : memref<128x128xf32, #tpu.memory_space<vmem>>, vector<128x128xf32>
    tpu.vector_store %arg6[%c0_6, %c0_7], %7 {strides = array<i32>} : memref<128x128xf32, #tpu.memory_space<vmem>>, vector<128x128xf32>,
    %c0_i32_8 = arith.constant 0 : i32
    %9 = arith.cmpi eq, %arg2, %c0_i32_8 : i32
    %10 = arith.extui %9 : i1 to i32
    %c0_i32_9 = arith.constant 0 : i32
    %11 = arith.cmpi ne, %10, %c0_i32_9 : i32
    scf.if %11 {
      %c0_10 = arith.constant 0 : index
      %c0_11 = arith.constant 0 : index
      %12 = vector.load %arg6[%c0_10, %c0_11] : memref<128x128xf32, #tpu.memory_space<vmem>>, vector<128x128xf32>
      %13 = arith.truncf %12 : vector<128x128xf32> to vector<128x128xbf16>
      %c0_12 = arith.constant 0 : index
      %c0_13 = arith.constant 0 : index
      %14 = vector.load %arg5[%c0_12, %c0_13] : memref<128x128xbf16, #tpu.memory_space<vmem>>, vector<128x128xbf16>
      tpu.vector_store %arg5[%c0_12, %c0_13], %13 {strides = array<i32>} : memref<128x128xbf16, #tpu.memory_space<vmem>>, vector<128x128xbf16>,
    } else {
    }
    return
  }
  func.func @transform_0(%arg0: i32, %arg1: i32, %arg2: i32) -> (i32, i32) {
    %c0_i32 = arith.constant 0 : i32
    return %arg0, %arg2 : i32, i32
  }
  func.func @transform_1(%arg0: i32, %arg1: i32, %arg2: i32) -> (i32, i32) {
    %c0_i32 = arith.constant 0 : i32
    return %arg2, %arg1 : i32, i32
  }
  func.func @transform_2(%arg0: i32, %arg1: i32, %arg2: i32) -> (i32, i32) {
    %c0_i32 = arith.constant 0 : i32
    return %arg0, %arg1 : i32, i32
  }
}

module attributes {stable_mosaic.version = 11 : i64} {
  func.func @_matmul_stats_kernel(%arg0: i32, %arg1: i32, %arg2: i32, %arg3: memref<32x128xbf16, #tpu.memory_space<vmem>>, %arg4: memref<128x128xbf16, #tpu.memory_space<vmem>>, %arg5: memref<32x128xbf16, #tpu.memory_space<vmem>>, %arg6: memref<1x128xf32, #tpu.memory_space<vmem>>, %arg7: memref<1x128xf32, #tpu.memory_space<vmem>>, %arg8: memref<32x128xf32, #tpu.memory_space<vmem>>) attributes {dimension_semantics = [#tpu.dimension_semantics<parallel>, #tpu.dimension_semantics<arbitrary>, #tpu.dimension_semantics<arbitrary>], iteration_bounds = array<i64: 1, 1, 1>, scalar_prefetch = 0 : i64, scratch_operands = 1 : i64, tpu.core_type = #tpu.core_type<tc>, window_params = [{transform_indices = @transform_0, window_bounds = array<i64: 32, 128>}, {transform_indices = @transform_1, window_bounds = array<i64: 128, 128>}, {transform_indices = @transform_2, window_bounds = array<i64: 32, 128>}, {transform_indices = @transform_3, window_bounds = array<i64: 1, 128>}, {transform_indices = @transform_4, window_bounds = array<i64: 1, 128>}]} {
    %c0_i32 = arith.constant 0 : i32
    %0 = arith.cmpi eq, %arg2, %c0_i32 : i32
    %1 = arith.extui %0 : i1 to i32
    %c0_i32_0 = arith.constant 0 : i32
    %2 = arith.cmpi ne, %1, %c0_i32_0 : i32
    scf.if %2 {
      %cst_13 = arith.constant 0.000000e+00 : f32
      %17 = vector.broadcast %cst_13 : f32 to vector<32x128xf32>
      %c0_14 = arith.constant 0 : index
      %c0_15 = arith.constant 0 : index
      %18 = vector.load %arg8[%c0_14, %c0_15] : memref<32x128xf32, #tpu.memory_space<vmem>>, vector<32x128xf32>
      tpu.vector_store %arg8[%c0_14, %c0_15], %17 {strides = array<i32>} : memref<32x128xf32, #tpu.memory_space<vmem>>, vector<32x128xf32>,
    } else {
    }
    %c0 = arith.constant 0 : index
    %c0_1 = arith.constant 0 : index
    %3 = vector.load %arg8[%c0, %c0_1] : memref<32x128xf32, #tpu.memory_space<vmem>>, vector<32x128xf32>
    %c0_2 = arith.constant 0 : index
    %c0_3 = arith.constant 0 : index
    %4 = vector.load %arg3[%c0_2, %c0_3] : memref<32x128xbf16, #tpu.memory_space<vmem>>, vector<32x128xbf16>
    %c0_4 = arith.constant 0 : index
    %c0_5 = arith.constant 0 : index
    %5 = vector.load %arg4[%c0_4, %c0_5] : memref<128x128xbf16, #tpu.memory_space<vmem>>, vector<128x128xbf16>
    %cst = arith.constant dense<0.000000e+00> : vector<32x128xf32>
    %6 = tpu.matmul %4, %5, %cst {dimension_numbers = #tpu.dot_dimension_numbers<[1], [0], [0], [1], [0, 0, 1, 1], [], []>} : vector<32x128xbf16>, vector<128x128xbf16>, vector<32x128xf32> -> vector<32x128xf32>
    %7 = arith.addf %3, %6 : vector<32x128xf32>
    %c0_6 = arith.constant 0 : index
    %c0_7 = arith.constant 0 : index
    %8 = vector.load %arg8[%c0_6, %c0_7] : memref<32x128xf32, #tpu.memory_space<vmem>>, vector<32x128xf32>
    tpu.vector_store %arg8[%c0_6, %c0_7], %7 {strides = array<i32>} : memref<32x128xf32, #tpu.memory_space<vmem>>, vector<32x128xf32>,
    %c0_i32_8 = arith.constant 0 : i32
    %9 = arith.cmpi eq, %arg1, %c0_i32_8 : i32
    %c0_i32_9 = arith.constant 0 : i32
    %10 = arith.cmpi eq, %arg2, %c0_i32_9 : i32
    %11 = arith.andi %9, %10 : i1
    %12 = arith.extui %11 : i1 to i32
    %c0_i32_10 = arith.constant 0 : i32
    %13 = arith.cmpi ne, %12, %c0_i32_10 : i32
    scf.if %13 {
      %cst_13 = arith.constant 0.000000e+00 : f32
      %17 = vector.broadcast %cst_13 : f32 to vector<1x128xf32>
      %c0_14 = arith.constant 0 : index
      %c0_15 = arith.constant 0 : index
      %18 = vector.load %arg6[%c0_14, %c0_15] : memref<1x128xf32, #tpu.memory_space<vmem>>, vector<1x128xf32>
      tpu.vector_store %arg6[%c0_14, %c0_15], %17 {strides = array<i32>} : memref<1x128xf32, #tpu.memory_space<vmem>>, vector<1x128xf32>,
      %cst_16 = arith.constant 0.000000e+00 : f32
      %19 = vector.broadcast %cst_16 : f32 to vector<1x128xf32>
      %c0_17 = arith.constant 0 : index
      %c0_18 = arith.constant 0 : index
      %20 = vector.load %arg7[%c0_17, %c0_18] : memref<1x128xf32, #tpu.memory_space<vmem>>, vector<1x128xf32>
      tpu.vector_store %arg7[%c0_17, %c0_18], %19 {strides = array<i32>} : memref<1x128xf32, #tpu.memory_space<vmem>>, vector<1x128xf32>,
    } else {
    }
    %c0_i32_11 = arith.constant 0 : i32
    %14 = arith.cmpi eq, %arg2, %c0_i32_11 : i32
    %15 = arith.extui %14 : i1 to i32
    %c0_i32_12 = arith.constant 0 : i32
    %16 = arith.cmpi ne, %15, %c0_i32_12 : i32
    scf.if %16 {
      %c0_13 = arith.constant 0 : index
      %c0_14 = arith.constant 0 : index
      %17 = vector.load %arg8[%c0_13, %c0_14] : memref<32x128xf32, #tpu.memory_space<vmem>>, vector<32x128xf32>
      %18 = arith.truncf %17 : vector<32x128xf32> to vector<32x128xbf16>
      %c0_15 = arith.constant 0 : index
      %c0_16 = arith.constant 0 : index
      %19 = vector.load %arg5[%c0_15, %c0_16] : memref<32x128xbf16, #tpu.memory_space<vmem>>, vector<32x128xbf16>
      tpu.vector_store %arg5[%c0_15, %c0_16], %18 {strides = array<i32>} : memref<32x128xbf16, #tpu.memory_space<vmem>>, vector<32x128xbf16>,
      %c0_17 = arith.constant 0 : index
      %c0_18 = arith.constant 0 : index
      %20 = vector.load %arg6[%c0_17, %c0_18] : memref<1x128xf32, #tpu.memory_space<vmem>>, vector<1x128xf32>
      %cst_19 = arith.constant dense<0.000000e+00> : vector<128xf32>
      %21 = vector.multi_reduction <add>, %17, %cst_19 [0] : vector<32x128xf32> to vector<128xf32>
      %22 = vector.shape_cast %21 : vector<128xf32> to vector<1x128xf32>
      %23 = arith.addf %20, %22 : vector<1x128xf32>
      %c0_20 = arith.constant 0 : index
      %c0_21 = arith.constant 0 : index
      %24 = vector.load %arg6[%c0_20, %c0_21] : memref<1x128xf32, #tpu.memory_space<vmem>>, vector<1x128xf32>
      tpu.vector_store %arg6[%c0_20, %c0_21], %23 {strides = array<i32>} : memref<1x128xf32, #tpu.memory_space<vmem>>, vector<1x128xf32>,
      %c0_22 = arith.constant 0 : index
      %c0_23 = arith.constant 0 : index
      %25 = vector.load %arg7[%c0_22, %c0_23] : memref<1x128xf32, #tpu.memory_space<vmem>>, vector<1x128xf32>
      %26 = arith.mulf %17, %17 : vector<32x128xf32>
      %cst_24 = arith.constant dense<0.000000e+00> : vector<128xf32>
      %27 = vector.multi_reduction <add>, %26, %cst_24 [0] : vector<32x128xf32> to vector<128xf32>
      %28 = vector.shape_cast %27 : vector<128xf32> to vector<1x128xf32>
      %29 = arith.addf %25, %28 : vector<1x128xf32>
      %c0_25 = arith.constant 0 : index
      %c0_26 = arith.constant 0 : index
      %30 = vector.load %arg7[%c0_25, %c0_26] : memref<1x128xf32, #tpu.memory_space<vmem>>, vector<1x128xf32>
      tpu.vector_store %arg7[%c0_25, %c0_26], %29 {strides = array<i32>} : memref<1x128xf32, #tpu.memory_space<vmem>>, vector<1x128xf32>,
    } else {
    }
    return
  }
  func.func @transform_0(%arg0: i32, %arg1: i32, %arg2: i32) -> (i32, i32) {
    %c0_i32 = arith.constant 0 : i32
    return %arg1, %arg2 : i32, i32
  }
  func.func @transform_1(%arg0: i32, %arg1: i32, %arg2: i32) -> (i32, i32) {
    %c0_i32 = arith.constant 0 : i32
    return %arg2, %arg0 : i32, i32
  }
  func.func @transform_2(%arg0: i32, %arg1: i32, %arg2: i32) -> (i32, i32) {
    %c0_i32 = arith.constant 0 : i32
    return %arg1, %arg0 : i32, i32
  }
  func.func @transform_3(%arg0: i32, %arg1: i32, %arg2: i32) -> (i32, i32) {
    %c0_i32 = arith.constant 0 : i32
    %c0_i32_0 = arith.constant 0 : i32
    return %c0_i32, %arg0 : i32, i32
  }
  func.func @transform_4(%arg0: i32, %arg1: i32, %arg2: i32) -> (i32, i32) {
    %c0_i32 = arith.constant 0 : i32
    %c0_i32_0 = arith.constant 0 : i32
    return %c0_i32, %arg0 : i32, i32
  }
}

module attributes {stable_mosaic.version = 11 : i64} {
  func.func @_bn_lrelu_kernel(%arg0: i32, %arg1: i32, %arg2: memref<32x128xbf16, #tpu.memory_space<vmem>>, %arg3: memref<1x128xf32, #tpu.memory_space<vmem>>, %arg4: memref<1x128xf32, #tpu.memory_space<vmem>>, %arg5: memref<32x128xbf16, #tpu.memory_space<vmem>>) attributes {dimension_semantics = [#tpu.dimension_semantics<parallel>, #tpu.dimension_semantics<parallel>], iteration_bounds = array<i64: 1, 1>, scalar_prefetch = 0 : i64, scratch_operands = 0 : i64, tpu.core_type = #tpu.core_type<tc>, window_params = [{transform_indices = @transform_0, window_bounds = array<i64: 32, 128>}, {transform_indices = @transform_1, window_bounds = array<i64: 1, 128>}, {transform_indices = @transform_2, window_bounds = array<i64: 1, 128>}, {transform_indices = @transform_3, window_bounds = array<i64: 32, 128>}]} {
    %c0 = arith.constant 0 : index
    %c0_0 = arith.constant 0 : index
    %0 = vector.load %arg2[%c0, %c0_0] : memref<32x128xbf16, #tpu.memory_space<vmem>>, vector<32x128xbf16>
    %1 = arith.extf %0 : vector<32x128xbf16> to vector<32x128xf32>
    %c0_1 = arith.constant 0 : index
    %c0_2 = arith.constant 0 : index
    %2 = vector.load %arg3[%c0_1, %c0_2] : memref<1x128xf32, #tpu.memory_space<vmem>>, vector<1x128xf32>
    %3 = vector.broadcast %2 : vector<1x128xf32> to vector<32x128xf32>
    %4 = arith.mulf %1, %3 : vector<32x128xf32>
    %c0_3 = arith.constant 0 : index
    %c0_4 = arith.constant 0 : index
    %5 = vector.load %arg4[%c0_3, %c0_4] : memref<1x128xf32, #tpu.memory_space<vmem>>, vector<1x128xf32>
    %6 = vector.broadcast %5 : vector<1x128xf32> to vector<32x128xf32>
    %7 = arith.addf %4, %6 : vector<32x128xf32>
    %cst = arith.constant 0.000000e+00 : f32
    %8 = vector.broadcast %cst : f32 to vector<32x128xf32>
    %9 = arith.cmpf ogt, %7, %8 : vector<32x128xf32>
    %cst_5 = arith.constant 2.000000e-01 : f32
    %10 = vector.broadcast %cst_5 : f32 to vector<32x128xf32>
    %11 = arith.mulf %10, %7 : vector<32x128xf32>
    %12 = arith.select %9, %7, %11 : vector<32x128xi1>, vector<32x128xf32>
    %13 = arith.truncf %12 : vector<32x128xf32> to vector<32x128xbf16>
    %c0_6 = arith.constant 0 : index
    %c0_7 = arith.constant 0 : index
    %14 = vector.load %arg5[%c0_6, %c0_7] : memref<32x128xbf16, #tpu.memory_space<vmem>>, vector<32x128xbf16>
    tpu.vector_store %arg5[%c0_6, %c0_7], %13 {strides = array<i32>} : memref<32x128xbf16, #tpu.memory_space<vmem>>, vector<32x128xbf16>,
    return
  }
  func.func @transform_0(%arg0: i32, %arg1: i32) -> (i32, i32) {
    %c0_i32 = arith.constant 0 : i32
    return %arg0, %arg1 : i32, i32
  }
  func.func @transform_1(%arg0: i32, %arg1: i32) -> (i32, i32) {
    %c0_i32 = arith.constant 0 : i32
    %c0_i32_0 = arith.constant 0 : i32
    return %c0_i32, %arg1 : i32, i32
  }
  func.func @transform_2(%arg0: i32, %arg1: i32) -> (i32, i32) {
    %c0_i32 = arith.constant 0 : i32
    %c0_i32_0 = arith.constant 0 : i32
    return %c0_i32, %arg1 : i32, i32
  }
  func.func @transform_3(%arg0: i32, %arg1: i32) -> (i32, i32) {
    %c0_i32 = arith.constant 0 : i32
    return %arg0, %arg1 : i32, i32
  }
}

module attributes {stable_mosaic.version = 11 : i64} {
  func.func @_matmul_stats_kernel(%arg0: i32, %arg1: i32, %arg2: i32, %arg3: memref<24x256xbf16, #tpu.memory_space<vmem>>, %arg4: memref<256x128xbf16, #tpu.memory_space<vmem>>, %arg5: memref<24x128xbf16, #tpu.memory_space<vmem>>, %arg6: memref<1x128xf32, #tpu.memory_space<vmem>>, %arg7: memref<1x128xf32, #tpu.memory_space<vmem>>, %arg8: memref<24x128xf32, #tpu.memory_space<vmem>>) attributes {dimension_semantics = [#tpu.dimension_semantics<parallel>, #tpu.dimension_semantics<arbitrary>, #tpu.dimension_semantics<arbitrary>], iteration_bounds = array<i64: 1, 1, 1>, scalar_prefetch = 0 : i64, scratch_operands = 1 : i64, tpu.core_type = #tpu.core_type<tc>, window_params = [{transform_indices = @transform_0, window_bounds = array<i64: 24, 256>}, {transform_indices = @transform_1, window_bounds = array<i64: 256, 128>}, {transform_indices = @transform_2, window_bounds = array<i64: 24, 128>}, {transform_indices = @transform_3, window_bounds = array<i64: 1, 128>}, {transform_indices = @transform_4, window_bounds = array<i64: 1, 128>}]} {
    %c0_i32 = arith.constant 0 : i32
    %0 = arith.cmpi eq, %arg2, %c0_i32 : i32
    %1 = arith.extui %0 : i1 to i32
    %c0_i32_0 = arith.constant 0 : i32
    %2 = arith.cmpi ne, %1, %c0_i32_0 : i32
    scf.if %2 {
      %cst_13 = arith.constant 0.000000e+00 : f32
      %17 = vector.broadcast %cst_13 : f32 to vector<24x128xf32>
      %c0_14 = arith.constant 0 : index
      %c0_15 = arith.constant 0 : index
      %18 = vector.load %arg8[%c0_14, %c0_15] : memref<24x128xf32, #tpu.memory_space<vmem>>, vector<24x128xf32>
      tpu.vector_store %arg8[%c0_14, %c0_15], %17 {strides = array<i32>} : memref<24x128xf32, #tpu.memory_space<vmem>>, vector<24x128xf32>,
    } else {
    }
    %c0 = arith.constant 0 : index
    %c0_1 = arith.constant 0 : index
    %3 = vector.load %arg8[%c0, %c0_1] : memref<24x128xf32, #tpu.memory_space<vmem>>, vector<24x128xf32>
    %c0_2 = arith.constant 0 : index
    %c0_3 = arith.constant 0 : index
    %4 = vector.load %arg3[%c0_2, %c0_3] : memref<24x256xbf16, #tpu.memory_space<vmem>>, vector<24x256xbf16>
    %c0_4 = arith.constant 0 : index
    %c0_5 = arith.constant 0 : index
    %5 = vector.load %arg4[%c0_4, %c0_5] : memref<256x128xbf16, #tpu.memory_space<vmem>>, vector<256x128xbf16>
    %cst = arith.constant dense<0.000000e+00> : vector<24x128xf32>
    %6 = tpu.matmul %4, %5, %cst {dimension_numbers = #tpu.dot_dimension_numbers<[1], [0], [0], [1], [0, 0, 1, 1], [], []>} : vector<24x256xbf16>, vector<256x128xbf16>, vector<24x128xf32> -> vector<24x128xf32>
    %7 = arith.addf %3, %6 : vector<24x128xf32>
    %c0_6 = arith.constant 0 : index
    %c0_7 = arith.constant 0 : index
    %8 = vector.load %arg8[%c0_6, %c0_7] : memref<24x128xf32, #tpu.memory_space<vmem>>, vector<24x128xf32>
    tpu.vector_store %arg8[%c0_6, %c0_7], %7 {strides = array<i32>} : memref<24x128xf32, #tpu.memory_space<vmem>>, vector<24x128xf32>,
    %c0_i32_8 = arith.constant 0 : i32
    %9 = arith.cmpi eq, %arg1, %c0_i32_8 : i32
    %c0_i32_9 = arith.constant 0 : i32
    %10 = arith.cmpi eq, %arg2, %c0_i32_9 : i32
    %11 = arith.andi %9, %10 : i1
    %12 = arith.extui %11 : i1 to i32
    %c0_i32_10 = arith.constant 0 : i32
    %13 = arith.cmpi ne, %12, %c0_i32_10 : i32
    scf.if %13 {
      %cst_13 = arith.constant 0.000000e+00 : f32
      %17 = vector.broadcast %cst_13 : f32 to vector<1x128xf32>
      %c0_14 = arith.constant 0 : index
      %c0_15 = arith.constant 0 : index
      %18 = vector.load %arg6[%c0_14, %c0_15] : memref<1x128xf32, #tpu.memory_space<vmem>>, vector<1x128xf32>
      tpu.vector_store %arg6[%c0_14, %c0_15], %17 {strides = array<i32>} : memref<1x128xf32, #tpu.memory_space<vmem>>, vector<1x128xf32>,
      %cst_16 = arith.constant 0.000000e+00 : f32
      %19 = vector.broadcast %cst_16 : f32 to vector<1x128xf32>
      %c0_17 = arith.constant 0 : index
      %c0_18 = arith.constant 0 : index
      %20 = vector.load %arg7[%c0_17, %c0_18] : memref<1x128xf32, #tpu.memory_space<vmem>>, vector<1x128xf32>
      tpu.vector_store %arg7[%c0_17, %c0_18], %19 {strides = array<i32>} : memref<1x128xf32, #tpu.memory_space<vmem>>, vector<1x128xf32>,
    } else {
    }
    %c0_i32_11 = arith.constant 0 : i32
    %14 = arith.cmpi eq, %arg2, %c0_i32_11 : i32
    %15 = arith.extui %14 : i1 to i32
    %c0_i32_12 = arith.constant 0 : i32
    %16 = arith.cmpi ne, %15, %c0_i32_12 : i32
    scf.if %16 {
      %c0_13 = arith.constant 0 : index
      %c0_14 = arith.constant 0 : index
      %17 = vector.load %arg8[%c0_13, %c0_14] : memref<24x128xf32, #tpu.memory_space<vmem>>, vector<24x128xf32>
      %18 = arith.truncf %17 : vector<24x128xf32> to vector<24x128xbf16>
      %c0_15 = arith.constant 0 : index
      %c0_16 = arith.constant 0 : index
      %19 = vector.load %arg5[%c0_15, %c0_16] : memref<24x128xbf16, #tpu.memory_space<vmem>>, vector<24x128xbf16>
      tpu.vector_store %arg5[%c0_15, %c0_16], %18 {strides = array<i32>} : memref<24x128xbf16, #tpu.memory_space<vmem>>, vector<24x128xbf16>,
      %c0_17 = arith.constant 0 : index
      %c0_18 = arith.constant 0 : index
      %20 = vector.load %arg6[%c0_17, %c0_18] : memref<1x128xf32, #tpu.memory_space<vmem>>, vector<1x128xf32>
      %cst_19 = arith.constant dense<0.000000e+00> : vector<128xf32>
      %21 = vector.multi_reduction <add>, %17, %cst_19 [0] : vector<24x128xf32> to vector<128xf32>
      %22 = vector.shape_cast %21 : vector<128xf32> to vector<1x128xf32>
      %23 = arith.addf %20, %22 : vector<1x128xf32>
      %c0_20 = arith.constant 0 : index
      %c0_21 = arith.constant 0 : index
      %24 = vector.load %arg6[%c0_20, %c0_21] : memref<1x128xf32, #tpu.memory_space<vmem>>, vector<1x128xf32>
      tpu.vector_store %arg6[%c0_20, %c0_21], %23 {strides = array<i32>} : memref<1x128xf32, #tpu.memory_space<vmem>>, vector<1x128xf32>,
      %c0_22 = arith.constant 0 : index
      %c0_23 = arith.constant 0 : index
      %25 = vector.load %arg7[%c0_22, %c0_23] : memref<1x128xf32, #tpu.memory_space<vmem>>, vector<1x128xf32>
      %26 = arith.mulf %17, %17 : vector<24x128xf32>
      %cst_24 = arith.constant dense<0.000000e+00> : vector<128xf32>
      %27 = vector.multi_reduction <add>, %26, %cst_24 [0] : vector<24x128xf32> to vector<128xf32>
      %28 = vector.shape_cast %27 : vector<128xf32> to vector<1x128xf32>
      %29 = arith.addf %25, %28 : vector<1x128xf32>
      %c0_25 = arith.constant 0 : index
      %c0_26 = arith.constant 0 : index
      %30 = vector.load %arg7[%c0_25, %c0_26] : memref<1x128xf32, #tpu.memory_space<vmem>>, vector<1x128xf32>
      tpu.vector_store %arg7[%c0_25, %c0_26], %29 {strides = array<i32>} : memref<1x128xf32, #tpu.memory_space<vmem>>, vector<1x128xf32>,
    } else {
    }
    return
  }
  func.func @transform_0(%arg0: i32, %arg1: i32, %arg2: i32) -> (i32, i32) {
    %c0_i32 = arith.constant 0 : i32
    return %arg1, %arg2 : i32, i32
  }
  func.func @transform_1(%arg0: i32, %arg1: i32, %arg2: i32) -> (i32, i32) {
    %c0_i32 = arith.constant 0 : i32
    return %arg2, %arg0 : i32, i32
  }
  func.func @transform_2(%arg0: i32, %arg1: i32, %arg2: i32) -> (i32, i32) {
    %c0_i32 = arith.constant 0 : i32
    return %arg1, %arg0 : i32, i32
  }
  func.func @transform_3(%arg0: i32, %arg1: i32, %arg2: i32) -> (i32, i32) {
    %c0_i32 = arith.constant 0 : i32
    %c0_i32_0 = arith.constant 0 : i32
    return %c0_i32, %arg0 : i32, i32
  }
  func.func @transform_4(%arg0: i32, %arg1: i32, %arg2: i32) -> (i32, i32) {
    %c0_i32 = arith.constant 0 : i32
    %c0_i32_0 = arith.constant 0 : i32
    return %c0_i32, %arg0 : i32, i32
  }
}

module attributes {stable_mosaic.version = 11 : i64} {
  func.func @_bn_lrelu_kernel(%arg0: i32, %arg1: i32, %arg2: memref<24x128xbf16, #tpu.memory_space<vmem>>, %arg3: memref<1x128xf32, #tpu.memory_space<vmem>>, %arg4: memref<1x128xf32, #tpu.memory_space<vmem>>, %arg5: memref<24x128xbf16, #tpu.memory_space<vmem>>) attributes {dimension_semantics = [#tpu.dimension_semantics<parallel>, #tpu.dimension_semantics<parallel>], iteration_bounds = array<i64: 1, 1>, scalar_prefetch = 0 : i64, scratch_operands = 0 : i64, tpu.core_type = #tpu.core_type<tc>, window_params = [{transform_indices = @transform_0, window_bounds = array<i64: 24, 128>}, {transform_indices = @transform_1, window_bounds = array<i64: 1, 128>}, {transform_indices = @transform_2, window_bounds = array<i64: 1, 128>}, {transform_indices = @transform_3, window_bounds = array<i64: 24, 128>}]} {
    %c0 = arith.constant 0 : index
    %c0_0 = arith.constant 0 : index
    %0 = vector.load %arg2[%c0, %c0_0] : memref<24x128xbf16, #tpu.memory_space<vmem>>, vector<24x128xbf16>
    %1 = arith.extf %0 : vector<24x128xbf16> to vector<24x128xf32>
    %c0_1 = arith.constant 0 : index
    %c0_2 = arith.constant 0 : index
    %2 = vector.load %arg3[%c0_1, %c0_2] : memref<1x128xf32, #tpu.memory_space<vmem>>, vector<1x128xf32>
    %3 = vector.broadcast %2 : vector<1x128xf32> to vector<24x128xf32>
    %4 = arith.mulf %1, %3 : vector<24x128xf32>
    %c0_3 = arith.constant 0 : index
    %c0_4 = arith.constant 0 : index
    %5 = vector.load %arg4[%c0_3, %c0_4] : memref<1x128xf32, #tpu.memory_space<vmem>>, vector<1x128xf32>
    %6 = vector.broadcast %5 : vector<1x128xf32> to vector<24x128xf32>
    %7 = arith.addf %4, %6 : vector<24x128xf32>
    %cst = arith.constant 0.000000e+00 : f32
    %8 = vector.broadcast %cst : f32 to vector<24x128xf32>
    %9 = arith.cmpf ogt, %7, %8 : vector<24x128xf32>
    %cst_5 = arith.constant 2.000000e-01 : f32
    %10 = vector.broadcast %cst_5 : f32 to vector<24x128xf32>
    %11 = arith.mulf %10, %7 : vector<24x128xf32>
    %12 = arith.select %9, %7, %11 : vector<24x128xi1>, vector<24x128xf32>
    %13 = arith.truncf %12 : vector<24x128xf32> to vector<24x128xbf16>
    %c0_6 = arith.constant 0 : index
    %c0_7 = arith.constant 0 : index
    %14 = vector.load %arg5[%c0_6, %c0_7] : memref<24x128xbf16, #tpu.memory_space<vmem>>, vector<24x128xbf16>
    tpu.vector_store %arg5[%c0_6, %c0_7], %13 {strides = array<i32>} : memref<24x128xbf16, #tpu.memory_space<vmem>>, vector<24x128xbf16>,
    return
  }
  func.func @transform_0(%arg0: i32, %arg1: i32) -> (i32, i32) {
    %c0_i32 = arith.constant 0 : i32
    return %arg0, %arg1 : i32, i32
  }
  func.func @transform_1(%arg0: i32, %arg1: i32) -> (i32, i32) {
    %c0_i32 = arith.constant 0 : i32
    %c0_i32_0 = arith.constant 0 : i32
    return %c0_i32, %arg1 : i32, i32
  }
  func.func @transform_2(%arg0: i32, %arg1: i32) -> (i32, i32) {
    %c0_i32 = arith.constant 0 : i32
    %c0_i32_0 = arith.constant 0 : i32
    return %c0_i32, %arg1 : i32, i32
  }
  func.func @transform_3(%arg0: i32, %arg1: i32) -> (i32, i32) {
    %c0_i32 = arith.constant 0 : i32
    return %arg0, %arg1 : i32, i32
  }
}

module attributes {stable_mosaic.version = 11 : i64} {
  func.func @_matmul_kernel(%arg0: i32, %arg1: i32, %arg2: i32, %arg3: memref<8x256xbf16, #tpu.memory_space<vmem>>, %arg4: memref<256x128xbf16, #tpu.memory_space<vmem>>, %arg5: memref<8x128xf32, #tpu.memory_space<vmem>>, %arg6: memref<8x128xf32, #tpu.memory_space<vmem>>) attributes {dimension_semantics = [#tpu.dimension_semantics<parallel>, #tpu.dimension_semantics<parallel>, #tpu.dimension_semantics<arbitrary>], iteration_bounds = array<i64: 1, 1, 1>, scalar_prefetch = 0 : i64, scratch_operands = 1 : i64, tpu.core_type = #tpu.core_type<tc>, window_params = [{transform_indices = @transform_0, window_bounds = array<i64: 8, 256>}, {transform_indices = @transform_1, window_bounds = array<i64: 256, 128>}, {transform_indices = @transform_2, window_bounds = array<i64: 8, 128>}]} {
    %c0_i32 = arith.constant 0 : i32
    %0 = arith.cmpi eq, %arg2, %c0_i32 : i32
    %1 = arith.extui %0 : i1 to i32
    %c0_i32_0 = arith.constant 0 : i32
    %2 = arith.cmpi ne, %1, %c0_i32_0 : i32
    scf.if %2 {
      %cst_10 = arith.constant 0.000000e+00 : f32
      %12 = vector.broadcast %cst_10 : f32 to vector<8x128xf32>
      %c0_11 = arith.constant 0 : index
      %c0_12 = arith.constant 0 : index
      %13 = vector.load %arg6[%c0_11, %c0_12] : memref<8x128xf32, #tpu.memory_space<vmem>>, vector<8x128xf32>
      tpu.vector_store %arg6[%c0_11, %c0_12], %12 {strides = array<i32>} : memref<8x128xf32, #tpu.memory_space<vmem>>, vector<8x128xf32>,
    } else {
    }
    %c0 = arith.constant 0 : index
    %c0_1 = arith.constant 0 : index
    %3 = vector.load %arg6[%c0, %c0_1] : memref<8x128xf32, #tpu.memory_space<vmem>>, vector<8x128xf32>
    %c0_2 = arith.constant 0 : index
    %c0_3 = arith.constant 0 : index
    %4 = vector.load %arg3[%c0_2, %c0_3] : memref<8x256xbf16, #tpu.memory_space<vmem>>, vector<8x256xbf16>
    %c0_4 = arith.constant 0 : index
    %c0_5 = arith.constant 0 : index
    %5 = vector.load %arg4[%c0_4, %c0_5] : memref<256x128xbf16, #tpu.memory_space<vmem>>, vector<256x128xbf16>
    %cst = arith.constant dense<0.000000e+00> : vector<8x128xf32>
    %6 = tpu.matmul %4, %5, %cst {dimension_numbers = #tpu.dot_dimension_numbers<[1], [0], [0], [1], [0, 0, 1, 1], [], []>} : vector<8x256xbf16>, vector<256x128xbf16>, vector<8x128xf32> -> vector<8x128xf32>
    %7 = arith.addf %3, %6 : vector<8x128xf32>
    %c0_6 = arith.constant 0 : index
    %c0_7 = arith.constant 0 : index
    %8 = vector.load %arg6[%c0_6, %c0_7] : memref<8x128xf32, #tpu.memory_space<vmem>>, vector<8x128xf32>
    tpu.vector_store %arg6[%c0_6, %c0_7], %7 {strides = array<i32>} : memref<8x128xf32, #tpu.memory_space<vmem>>, vector<8x128xf32>,
    %c0_i32_8 = arith.constant 0 : i32
    %9 = arith.cmpi eq, %arg2, %c0_i32_8 : i32
    %10 = arith.extui %9 : i1 to i32
    %c0_i32_9 = arith.constant 0 : i32
    %11 = arith.cmpi ne, %10, %c0_i32_9 : i32
    scf.if %11 {
      %c0_10 = arith.constant 0 : index
      %c0_11 = arith.constant 0 : index
      %12 = vector.load %arg6[%c0_10, %c0_11] : memref<8x128xf32, #tpu.memory_space<vmem>>, vector<8x128xf32>
      %c0_12 = arith.constant 0 : index
      %c0_13 = arith.constant 0 : index
      %13 = vector.load %arg5[%c0_12, %c0_13] : memref<8x128xf32, #tpu.memory_space<vmem>>, vector<8x128xf32>
      tpu.vector_store %arg5[%c0_12, %c0_13], %12 {strides = array<i32>} : memref<8x128xf32, #tpu.memory_space<vmem>>, vector<8x128xf32>,
    } else {
    }
    return
  }
  func.func @transform_0(%arg0: i32, %arg1: i32, %arg2: i32) -> (i32, i32) {
    %c0_i32 = arith.constant 0 : i32
    return %arg0, %arg2 : i32, i32
  }
  func.func @transform_1(%arg0: i32, %arg1: i32, %arg2: i32) -> (i32, i32) {
    %c0_i32 = arith.constant 0 : i32
    return %arg2, %arg1 : i32, i32
  }
  func.func @transform_2(%arg0: i32, %arg1: i32, %arg2: i32) -> (i32, i32) {
    %c0_i32 = arith.constant 0 : i32
    return %arg0, %arg1 : i32, i32
  }
}

</mosaic_0001>

<bundles_post_ra>
// kernel: _lambda_.6
= control target key start
LH: loop header
LB: loop body
LE: loop exit
PB: predicated region body
PF: predicated region fallthrough
CT: control target
= control target key end

     0   :  { %s670_s1 = inlined_call_operand.vmem [shape: bf16[128,128], index: 1, kind: input, shape index: {}]   ;;  %s671_s0 = inlined_call_operand.vmem [shape: bf16[128,128], index: 0, kind: input, shape index: {}]   ;;  %s672_s2 = inlined_call_operand.vmem [shape: bf16[128,128], index: 2, kind: output, shape index: {}]  }
   0x1   :  { %v567_v0 = vld [vmem:[%s670_s1 + $0x38] sm:$0xff]   ;;  %v568_v1 = vld [vmem:[%s670_s1 + $0x30] sm:$0xff]   ;;  %v569_v2 = vld [vmem:[%s670_s1 + $0x28] sm:$0xff]  }
   0x2   :  { %519 = vmatprep.subr.bf16.mxu0 %v567_v0  ;;  %551 = vmatprep.subr.bf16.mxu1 %v567_v0  ;;  %v570_v3 = vld [vmem:[%s670_s1 + $0x20] sm:$0xff]   ;;  %v571_v6 = vld [vmem:[%s670_s1 + $0x18] sm:$0xff]   ;;  %v572_v7 = vld [vmem:[%s670_s1 + $0x10] sm:$0xff]  }
   0x3   :  { %520 = vmatpush3.bf16.msra.mxu0 %v567_v0  ;;  %559 = vmatpush3.bf16.msra.mxu1 %v567_v0  ;;  %v575_v4 = vld [vmem:[%s671_s0] sm:$0xff]   ;;  %v573_v8 = vld [vmem:[%s670_s1 + $0x8] sm:$0xff]   ;;  %v579_v12 = vld [vmem:[%s671_s0 + $0x10] sm:$0xff]  }
   0x4   :  { %521 = vmatprep.subr.bf16.mxu0 %v568_v1  ;;  %552 = vmatprep.subr.bf16.mxu1 %v568_v1  ;;  %v576_v5 = vld [vmem:[%s671_s0 + $0x20] sm:$0xff]   ;;  %v577_v10 = vld [vmem:[%s671_s0 + $0x8] sm:$0xff]   ;;  %v580_v13 = vld [vmem:[%s671_s0 + $0x30] sm:$0xff]  }
   0x5   :  { %535 = vmatprep.mubr.bf16.mxu0 %v575_v4  ;;  %543 = vmatprep.mubr.bf16.mxu1 %v576_v5  ;;  %v574_v9 = vld [vmem:[%s670_s1] sm:$0xff]   ;;  %v578_v11 = vld [vmem:[%s671_s0 + $0x28] sm:$0xff]   ;;  %v581_v14 = vld [vmem:[%s671_s0 + $0x18] sm:$0xff]  }
   0x6   :  { %v582_v15 = vld [vmem:[%s671_s0 + $0x38] sm:$0xff]  }
   0x7   :  { %522 = vmatpush3.bf16.msra.mxu0 %v568_v1  ;;  %560 = vmatpush3.bf16.msra.mxu1 %v568_v1 }
   0x8   :  { %523 = vmatprep.subr.bf16.mxu0 %v569_v2  ;;  %553 = vmatprep.subr.bf16.mxu1 %v569_v2 }
   0xb   :  { %524 = vmatpush3.bf16.msra.mxu0 %v569_v2  ;;  %561 = vmatpush3.bf16.msra.mxu1 %v569_v2 }
   0xc   :  { %525 = vmatprep.subr.bf16.mxu0 %v570_v3  ;;  %554 = vmatprep.subr.bf16.mxu1 %v570_v3 }
   0xf   :  { %526 = vmatpush3.bf16.msra.mxu0 %v570_v3  ;;  %562 = vmatpush3.bf16.msra.mxu1 %v570_v3 }
  0x10   :  { %527 = vmatprep.subr.bf16.mxu0 %v571_v6  ;;  %555 = vmatprep.subr.bf16.mxu1 %v571_v6 }
  0x13   :  { %528 = vmatpush3.bf16.msra.mxu0 %v571_v6  ;;  %563 = vmatpush3.bf16.msra.mxu1 %v571_v6 }
  0x14   :  { %529 = vmatprep.subr.bf16.mxu0 %v572_v7  ;;  %556 = vmatprep.subr.bf16.mxu1 %v572_v7 }
  0x17   :  { %530 = vmatpush3.bf16.msra.mxu0 %v572_v7  ;;  %564 = vmatpush3.bf16.msra.mxu1 %v572_v7 }
  0x18   :  { %531 = vmatprep.subr.bf16.mxu0 %v573_v8  ;;  %557 = vmatprep.subr.bf16.mxu1 %v573_v8 }
  0x1b   :  { %532 = vmatpush3.bf16.msra.mxu0 %v573_v8  ;;  %565 = vmatpush3.bf16.msra.mxu1 %v573_v8 }
  0x1c   :  { %533 = vmatprep.subr.bf16.mxu0 %v574_v9  ;;  %558 = vmatprep.subr.bf16.mxu1 %v574_v9 }
  0x1f   :  { %534 = vmatpush3.bf16.msra.mxu0 %v574_v9  ;;  %566 = vmatpush3.bf16.msra.mxu1 %v574_v9 }
  0x22   :  { %536 = vmatmul.mubr.bf16.vlgmr.msra.gmra.mxu0 %v577_v10  ;;  %544 = vmatmul.mubr.bf16.vlgmr.msra.gmra.mxu1 %v578_v11 }
  0x23   :  { %539 = vmatprep.mubr.bf16.mxu0 %v579_v12  ;;  %547 = vmatprep.mubr.bf16.mxu1 %v580_v13 }
  0x2a   :  { %540 = vmatmul.mubr.bf16.gmra.mxu0 %v581_v14  ;;  %548 = vmatmul.mubr.bf16.gmra.mxu1 %v582_v15 }
  0xe2   :  { %v537_v16 = vpop.f32.mrf.mxu0  ;;  %v545_v17 = vpop.f32.mrf.mxu1 }
  0xe4   :  { %v210_v18 = vpop.f32.mrf.mxu0  ;;  %v242_v19 = vpop.f32.mrf.mxu1 }
  0xe6   :  { %v538_v20 = vpop.f32.mrf.mxu0  ;;  %v546_v21 = vpop.f32.mrf.mxu1 }
  0xe7   :  { %v464_v22 = vpack.c.bf16 %v538_v20, %v537_v16  ;;  %v484_v23 = vpack.c.bf16 %v546_v21, %v545_v17 }
  0xe8   :  { %v213_v24 = vpop.f32.mrf.mxu0  ;;  %v245_v25 = vpop.f32.mrf.mxu1 }
  0xe9   :  { %496 = vst [vmem:[%s672_s2 + $0x8] sm:$0xff] %v464_v22   ;;  %500 = vst [vmem:[%s672_s2 + $0x28] sm:$0xff] %v484_v23   ;;  %v459_v26 = vpack.c.bf16 %v213_v24, %v210_v18  ;;  %v479_v27 = vpack.c.bf16 %v245_v25, %v242_v19 }
  0xea   :  { %v541_v28 = vpop.f32.mrf.mxu0  ;;  %v549_v29 = vpop.f32.mrf.mxu1 }
  0xeb   :  { %460 = vst [vmem:[%s672_s2] sm:$0xff] %v459_v26   ;;  %499 = vst [vmem:[%s672_s2 + $0x20] sm:$0xff] %v479_v27  }
  0xec   :  { %v226_v30 = vpop.f32.mrf.mxu0  ;;  %v258_v31 = vpop.f32.mrf.mxu1 }
  0xee   :  { %v542_v32 = vpop.f32.mrf.mxu0  ;;  %v550_v33 = vpop.f32.mrf.mxu1 }
  0xef   :  { %v474_v34 = vpack.c.bf16 %v542_v32, %v541_v28  ;;  %v494_v35 = vpack.c.bf16 %v550_v33, %v549_v29 }
  0xf0   :  { %v229_v36 = vpop.f32.mrf.mxu0  ;;  %v261_v37 = vpop.f32.mrf.mxu1 }
  0xf1   :  { %498 = vst [vmem:[%s672_s2 + $0x18] sm:$0xff] %v474_v34   ;;  %502 = vst [vmem:[%s672_s2 + $0x38] sm:$0xff] %v494_v35   ;;  %v469_v38 = vpack.c.bf16 %v229_v36, %v226_v30  ;;  %v489_v39 = vpack.c.bf16 %v261_v37, %v258_v31 }
  0xf3   :  { %497 = vst [vmem:[%s672_s2 + $0x10] sm:$0xff] %v469_v38   ;;  %501 = vst [vmem:[%s672_s2 + $0x30] sm:$0xff] %v489_v39  }

// kernel: _lambda_.8
= control target key start
LH: loop header
LB: loop body
LE: loop exit
PB: predicated region body
PF: predicated region fallthrough
CT: control target
= control target key end

     0   :  { %s148_s0 = inlined_call_operand.vmem [shape: bf16[32,128], index: 0, kind: input, shape index: {}]   ;;  %s149_s1 = inlined_call_operand.vmem [shape: f32[1,128], index: 1, kind: input, shape index: {}]   ;;  %s150_s2 = inlined_call_operand.vmem [shape: f32[1,128], index: 2, kind: input, shape index: {}]   ;;  %s151_s3 = inlined_call_operand.vmem [shape: bf16[32,128], index: 3, kind: output, shape index: {}]  }
   0x1   :  { %v91_v0 = vld [vmem:[%s148_s0] sm:$0xff]   ;;  %v108_v4 = vld [vmem:[%s148_s0 + $0x8] sm:$0xff]  }
   0x2   :  { %v80_v1 = vld [vmem:[%s149_s1] ss:$0 sm:$0xff]  ;;  %v92_v2 = vunpack.c.l.bf16 %v91_v0  ;;  %v93_v3 = vunpack.c.h.bf16 %v91_v0  ;;  %v96_v6 = vunpack.c.l.bf16 %v108_v4  ;;  %v97_v7 = vunpack.c.h.bf16 %v108_v4 }
   0x3   :  { %v81_v5 = vld [vmem:[%s150_s2] ss:$0 sm:$0xff] }
   0x4   :  { %v29_v8 = vmul.f32 %v92_v2, %v80_v1  ;;  %v30_v9 = vmul.f32 %v93_v3, %v80_v1  ;;  %v31_v10 = vmul.f32 %v96_v6, %v80_v1  ;;  %v32_v11 = vmul.f32 %v97_v7, %v80_v1 }
   0x6   :  { %v40_v12 = vadd.f32 %v81_v5, %v29_v8  ;;  %v41_v13 = vadd.f32 %v81_v5, %v30_v9  ;;  %v42_v14 = vadd.f32 %v81_v5, %v31_v10  ;;  %v43_v15 = vadd.f32 %v81_v5, %v32_v11 }
   0x8   :  { %vm44_vm0 = vcmp.gt.f32.partialorder %v40_v12, 0.0  ;;  %vm45_vm1 = vcmp.gt.f32.partialorder %v41_v13, 0.0  ;;  %v48_v16 = vmul.f32 0.2, %v40_v12  ;;  %v49_v17 = vmul.f32 0.2, %v41_v13 }
   0x9   :  { %vm46_vm2 = vcmp.gt.f32.partialorder %v42_v14, 0.0  ;;  %vm47_vm3 = vcmp.gt.f32.partialorder %v43_v15, 0.0  ;;  %v50_v18 = vmul.f32 0.2, %v42_v14  ;;  %v51_v19 = vmul.f32 0.2, %v43_v15 }
   0xa   :  { %v52_v20 = vsel %vm44_vm0, %v40_v12, %v48_v16  ;;  %v53_v21 = vsel %vm45_vm1, %v41_v13, %v49_v17 }
   0xb   :  { %v101_v22 = vpack.c.bf16 %v53_v21, %v52_v20  ;;  %v54_v23 = vsel %vm46_vm2, %v42_v14, %v50_v18  ;;  %v55_v24 = vsel %vm47_vm3, %v43_v15, %v51_v19 }
   0xc   :  { %v106_v25 = vpack.c.bf16 %v55_v24, %v54_v23 }
   0xd   :  { %102 = vst [vmem:[%s151_s3] sm:$0xff] %v101_v22  }
   0xe   :  { %109 = vst [vmem:[%s151_s3 + $0x8] sm:$0xff] %v106_v25  }

// kernel: _lambda_.7
= control target key start
LH: loop header
LB: loop body
LE: loop exit
PB: predicated region body
PF: predicated region fallthrough
CT: control target
= control target key end

     0   :  { %v308_v10 = vmov 0.0   ;;  %s388_s1 = inlined_call_operand.vmem [shape: bf16[128,128], index: 1, kind: input, shape index: {}]   ;;  %s389_s0 = inlined_call_operand.vmem [shape: bf16[32,128], index: 0, kind: input, shape index: {}]   ;;  %s390_s3 = inlined_call_operand.vmem [shape: f32[1,128], index: 3, kind: output, shape index: {1}]   ;;  %s391_s4 = inlined_call_operand.vmem [shape: f32[1,128], index: 4, kind: output, shape index: {2}]   ;;  %s392_s2 = inlined_call_operand.vmem [shape: bf16[32,128], index: 2, kind: output, shape index: {0}]  }
   0x1   :  { %v298_v0 = vld [vmem:[%s388_s1 + $0x38] sm:$0xff]   ;;  %v299_v1 = vld [vmem:[%s388_s1 + $0x30] sm:$0xff]   ;;  %v300_v2 = vld [vmem:[%s388_s1 + $0x28] sm:$0xff]   ;;  %169 = vst [vmem:[%s390_s3] sm:$0x1] %v308_v10 }
   0x2   :  { %277 = vmatprep.subr.bf16.mxu0 %v298_v0  ;;  %v301_v3 = vld [vmem:[%s388_s1 + $0x20] sm:$0xff]   ;;  %v302_v5 = vld [vmem:[%s388_s1 + $0x18] sm:$0xff]   ;;  %v303_v6 = vld [vmem:[%s388_s1 + $0x10] sm:$0xff]   ;;  %170 = vst [vmem:[%s391_s4] sm:$0x1] %v308_v10 }
   0x3   :  { %278 = vmatpush3.bf16.msra.mxu0 %v298_v0  ;;  %v306_v4 = vld [vmem:[%s389_s0] sm:$0xff]   ;;  %v304_v7 = vld [vmem:[%s388_s1 + $0x8] sm:$0xff]  }
   0x4   :  { %279 = vmatprep.subr.bf16.mxu0 %v299_v1  ;;  %293 = vmatprep.mubr.bf16.mxu0 %v306_v4  ;;  %v305_v8 = vld [vmem:[%s388_s1] sm:$0xff]   ;;  %v307_v9 = vld [vmem:[%s389_s0 + $0x8] sm:$0xff]  }
   0x7   :  { %280 = vmatpush3.bf16.msra.mxu0 %v299_v1 }
   0x8   :  { %281 = vmatprep.subr.bf16.mxu0 %v300_v2  ;;  %v198_v36 = vld [vmem:[%s390_s3] sm:$0x1] }
   0x9   :  { %v210_v39 = vld [vmem:[%s391_s4] sm:$0x1] }
   0xb   :  { %282 = vmatpush3.bf16.msra.mxu0 %v300_v2 }
   0xc   :  { %283 = vmatprep.subr.bf16.mxu0 %v301_v3 }
   0xf   :  { %284 = vmatpush3.bf16.msra.mxu0 %v301_v3 }
  0x10   :  { %285 = vmatprep.subr.bf16.mxu0 %v302_v5 }
  0x13   :  { %286 = vmatpush3.bf16.msra.mxu0 %v302_v5 }
  0x14   :  { %287 = vmatprep.subr.bf16.mxu0 %v303_v6 }
  0x17   :  { %288 = vmatpush3.bf16.msra.mxu0 %v303_v6 }
  0x18   :  { %289 = vmatprep.subr.bf16.mxu0 %v304_v7 }
  0x1b   :  { %290 = vmatpush3.bf16.msra.mxu0 %v304_v7 }
  0x1c   :  { %291 = vmatprep.subr.bf16.mxu0 %v305_v8 }
  0x1f   :  { %292 = vmatpush3.bf16.msra.mxu0 %v305_v8 }
  0x22   :  { %294 = vmatmul.mubr.bf16.vlgmr.msra.gmra.mxu0 %v307_v9 }
  0xe2   :  { %v295_v11 = vpop.f32.mrf.mxu0 }
  0xe3   :  { %v213_v20 = vmul.f32 %v295_v11, %v295_v11 }
  0xe4   :  { %v141_v12 = vpop.f32.mrf.mxu0 }
  0xe5   :  { %v211_v16 = vmul.f32 %v141_v12, %v141_v12 }
  0xe6   :  { %v296_v13 = vpop.f32.mrf.mxu0 }
  0xe7   :  { %v264_v14 = vpack.c.bf16 %v296_v13, %v295_v11  ;;  %v214_v23 = vmul.f32 %v296_v13, %v296_v13 }
  0xe8   :  { %v144_v15 = vpop.f32.mrf.mxu0 }
  0xe9   :  { %v259_v17 = vpack.c.bf16 %v144_v15, %v141_v12  ;;  %266 = vst [vmem:[%s392_s2 + $0x8] sm:$0xff] %v264_v14   ;;  %v199_v18 = vadd.f32 %v144_v15, %v141_v12  ;;  %v212_v19 = vmul.f32 %v144_v15, %v144_v15 }
  0xeb   :  { %260 = vst [vmem:[%s392_s2] sm:$0xff] %v259_v17   ;;  %v200_v21 = vadd.f32 %v295_v11, %v199_v18  ;;  %v215_v22 = vadd.f32 %v212_v19, %v211_v16 }
  0xed   :  { %v201_v24 = vadd.f32 %v296_v13, %v200_v21  ;;  %v216_v25 = vadd.f32 %v215_v22, %v213_v20 }
  0xef   :  { %v202_v26 = vrot.slane %v201_v24, 4  ;;  %v217_v27 = vadd.f32 %v216_v25, %v214_v23 }
  0xf1   :  { %v203_v28 = vadd.f32 %v202_v26, %v201_v24  ;;  %v218_v29 = vrot.slane %v217_v27, 4 }
  0xf3   :  { %v204_v30 = vrot.slane %v203_v28, 2  ;;  %v219_v31 = vadd.f32 %v218_v29, %v217_v27 }
  0xf5   :  { %v205_v32 = vadd.f32 %v204_v30, %v203_v28  ;;  %v220_v33 = vrot.slane %v219_v31, 2 }
  0xf7   :  { %v206_v34 = vrot.slane %v205_v32, 1  ;;  %v221_v35 = vadd.f32 %v220_v33, %v219_v31 }
  0xf9   :  { %v207_v37 = vadd.f32 %v206_v34, %v205_v32  ;;  %v222_v38 = vrot.slane %v221_v35, 1 }
  0xfb   :  { %v208_v40 = vadd.f32 %v207_v37, %v198_v36  ;;  %v223_v41 = vadd.f32 %v222_v38, %v221_v35 }
  0xfd   :  { %209 = vst [vmem:[%s390_s3] sm:$0x1] %v208_v40  ;;  %v224_v42 = vadd.f32 %v223_v41, %v210_v39 }
  0xff   :  { %225 = vst [vmem:[%s391_s4] sm:$0x1] %v224_v42 }

// kernel: _lambda_.10
= control target key start
LH: loop header
LB: loop body
LE: loop exit
PB: predicated region body
PF: predicated region fallthrough
CT: control target
= control target key end

     0   :  { %s124_s0 = inlined_call_operand.vmem [shape: bf16[24,128], index: 0, kind: input, shape index: {}]   ;;  %s125_s1 = inlined_call_operand.vmem [shape: f32[1,128], index: 1, kind: input, shape index: {}]   ;;  %s126_s2 = inlined_call_operand.vmem [shape: f32[1,128], index: 2, kind: input, shape index: {}]   ;;  %s127_s3 = inlined_call_operand.vmem [shape: bf16[24,128], index: 3, kind: output, shape index: {}]  }
   0x1   :  { %v78_v0 = vld [vmem:[%s124_s0] sm:$0xff]   ;;  %v16_v4 = vld [vmem:[%s124_s0 + $0x8] sm:$0xf] }
   0x2   :  { %v69_v1 = vld [vmem:[%s125_s1] ss:$0 sm:$0xff]  ;;  %v79_v2 = vunpack.c.l.bf16 %v78_v0  ;;  %v80_v3 = vunpack.c.h.bf16 %v78_v0  ;;  %v19_v6 = vunpack.c.l.bf16 %v16_v4 }
   0x3   :  { %v70_v5 = vld [vmem:[%s126_s2] ss:$0 sm:$0xff] }
   0x4   :  { %v27_v7 = vmul.f32 %v79_v2, %v69_v1  ;;  %v28_v8 = vmul.f32 %v80_v3, %v69_v1  ;;  %v29_v9 = vmul.f32 %v69_v1, %v19_v6 }
   0x6   :  { %v37_v10 = vadd.f32 %v70_v5, %v27_v7  ;;  %v38_v11 = vadd.f32 %v70_v5, %v28_v8  ;;  %v39_v12 = vadd.f32 %v70_v5, %v29_v9 }
   0x8   :  { %vm40_vm0 = vcmp.gt.f32.partialorder %v37_v10, 0.0  ;;  %vm41_vm1 = vcmp.gt.f32.partialorder %v38_v11, 0.0  ;;  %v43_v13 = vmul.f32 0.2, %v37_v10  ;;  %v44_v14 = vmul.f32 0.2, %v38_v11 }
   0x9   :  { %vm42_vm2 = vcmp.gt.f32.partialorder %v39_v12, 0.0  ;;  %v45_v15 = vmul.f32 0.2, %v39_v12 }
   0xa   :  { %v46_v16 = vsel %vm40_vm0, %v37_v10, %v43_v13  ;;  %v47_v17 = vsel %vm41_vm1, %v38_v11, %v44_v14 }
   0xb   :  { %v84_v18 = vpack.c.bf16 %v47_v17, %v46_v16  ;;  %v48_v19 = vsel %vm42_vm2, %v39_v12, %v45_v15 }
   0xc   :  { %v76_v20 = vpack.c.bf16 %v48_v19, %v48_v19 }
   0xd   :  { %85 = vst [vmem:[%s127_s3] sm:$0xff] %v84_v18  }
   0xe   :  { %64 = vst [vmem:[%s127_s3 + $0x8] sm:$0xf] %v76_v20 }

// kernel: _lambda_.9
= control target key start
LH: loop header
LB: loop body
LE: loop exit
PB: predicated region body
PF: predicated region fallthrough
CT: control target
= control target key end

     0   :  { %v390_v21 = vmov 0.0   ;;  %s497_s1 = inlined_call_operand.vmem [shape: bf16[256,128], index: 1, kind: input, shape index: {}]   ;;  %s498_s0 = inlined_call_operand.vmem [shape: bf16[24,256], index: 0, kind: input, shape index: {}]   ;;  %s499_s3 = inlined_call_operand.vmem [shape: f32[1,128], index: 3, kind: output, shape index: {1}]   ;;  %s500_s4 = inlined_call_operand.vmem [shape: f32[1,128], index: 4, kind: output, shape index: {2}]   ;;  %s501_s2 = inlined_call_operand.vmem [shape: bf16[24,128], index: 2, kind: output, shape index: {0}]  }
   0x1   :  { %v369_v0 = vld [vmem:[%s497_s1 + $0x78] sm:$0xff]   ;;  %v371_v2 = vld [vmem:[%s497_s1 + $0x70] sm:$0xff]   ;;  %v373_v4 = vld [vmem:[%s497_s1 + $0x68] sm:$0xff]   ;;  %232 = vst [vmem:[%s499_s3] sm:$0x1] %v390_v21 }
   0x2   :  { %v370_v1 = vld [vmem:[%s497_s1 + $0x38] sm:$0xff]   ;;  %324 = vmatprep.subr.bf16.mxu0 %v369_v0  ;;  %352 = vmatprep.subr.bf16.mxu1 %v369_v0  ;;  %v372_v3 = vld [vmem:[%s497_s1 + $0x30] sm:$0xff]   ;;  %v374_v5 = vld [vmem:[%s497_s1 + $0x28] sm:$0xff]   ;;  %233 = vst [vmem:[%s500_s4] sm:$0x1] %v390_v21 }
   0x3   :  { %325 = vmatpush3.bf16.msra.mxu0 %v370_v1  ;;  %360 = vmatpush3.bf16.msra.mxu1 %v370_v1  ;;  %v375_v6 = vld [vmem:[%s497_s1 + $0x60] sm:$0xff]   ;;  %v377_v8 = vld [vmem:[%s497_s1 + $0x58] sm:$0xff]   ;;  %v379_v10 = vld [vmem:[%s497_s1 + $0x50] sm:$0xff]  }
   0x4   :  { %326 = vmatprep.subr.bf16.mxu0 %v371_v2  ;;  %353 = vmatprep.subr.bf16.mxu1 %v371_v2  ;;  %v376_v7 = vld [vmem:[%s497_s1 + $0x20] sm:$0xff]   ;;  %v378_v9 = vld [vmem:[%s497_s1 + $0x18] sm:$0xff]   ;;  %v27_v12 = vld [vmem:[%s498_s0 + $0x10] sm:$0xff] }
   0x5   :  { %v387_v11 = vld [vmem:[%s498_s0 + $0x4] ss:$8 sps:$4 sm:$0xff]   ;;  %v296_v13 = vcombine.high %v27_v12, %v27_v12  ;;  %v380_v14 = vld [vmem:[%s497_s1 + $0x10] sm:$0xff]   ;;  %v385_v19 = vld [vmem:[%s498_s0] ss:$8 sps:$4 sm:$0xff]   ;;  %v295_v20 = vcombine.low %v27_v12, %v27_v12 }
   0x6   :  { %v381_v15 = vld [vmem:[%s497_s1 + $0x48] sm:$0xff]   ;;  %205 = vmatprep.mubr.bf16.mxu0 %v387_v11  ;;  %v383_v17 = vld [vmem:[%s497_s1 + $0x40] sm:$0xff]  }
   0x7   :  { %327 = vmatpush3.bf16.msra.mxu0 %v372_v3  ;;  %361 = vmatpush3.bf16.msra.mxu1 %v372_v3  ;;  %v382_v16 = vld [vmem:[%s497_s1 + $0x8] sm:$0xff]   ;;  %v384_v18 = vld [vmem:[%s497_s1] sm:$0xff]  }
   0x8   :  { %328 = vmatprep.subr.bf16.mxu0 %v373_v4  ;;  %354 = vmatprep.subr.bf16.mxu1 %v373_v4  ;;  %v256_v51 = vld [vmem:[%s499_s3] sm:$0x1] }
   0x9   :  { %213 = vmatprep.mubr.bf16.mxu1 %v296_v13  ;;  %v267_v54 = vld [vmem:[%s500_s4] sm:$0x1] }
   0xb   :  { %329 = vmatpush3.bf16.msra.mxu0 %v374_v5  ;;  %362 = vmatpush3.bf16.msra.mxu1 %v374_v5 }
   0xc   :  { %330 = vmatprep.subr.bf16.mxu0 %v375_v6  ;;  %355 = vmatprep.subr.bf16.mxu1 %v375_v6 }
   0xf   :  { %331 = vmatpush3.bf16.msra.mxu0 %v376_v7  ;;  %363 = vmatpush3.bf16.msra.mxu1 %v376_v7 }
  0x10   :  { %332 = vmatprep.subr.bf16.mxu0 %v377_v8  ;;  %356 = vmatprep.subr.bf16.mxu1 %v377_v8 }
  0x13   :  { %333 = vmatpush3.bf16.msra.mxu0 %v378_v9  ;;  %364 = vmatpush3.bf16.msra.mxu1 %v378_v9 }
  0x14   :  { %334 = vmatprep.subr.bf16.mxu0 %v379_v10  ;;  %357 = vmatprep.subr.bf16.mxu1 %v379_v10 }
  0x17   :  { %335 = vmatpush3.bf16.msra.mxu0 %v380_v14  ;;  %365 = vmatpush3.bf16.msra.mxu1 %v380_v14 }
  0x18   :  { %336 = vmatprep.subr.bf16.mxu0 %v381_v15  ;;  %358 = vmatprep.subr.bf16.mxu1 %v381_v15 }
  0x1b   :  { %337 = vmatpush3.bf16.msra.mxu0 %v382_v16  ;;  %366 = vmatpush3.bf16.msra.mxu1 %v382_v16 }
  0x1c   :  { %338 = vmatprep.subr.bf16.mxu0 %v383_v17  ;;  %359 = vmatprep.subr.bf16.mxu1 %v383_v17 }
  0x1f   :  { %339 = vmatpush3.bf16.msra.mxu0 %v384_v18  ;;  %367 = vmatpush3.bf16.msra.mxu1 %v384_v18 }
  0x22   :  { %206 = vmatmul.mubr.bf16.vlgmr.msra.gmra.mxu0 %v385_v19  ;;  %214 = vmatmul.mubr.bf16.vlgmr.msra.gmra.mxu1 %v295_v20 }
  0xe2   :  { %v340_v22 = vpop.f32.mrf.mxu0  ;;  %v346_v23 = vpop.f32.mrf.mxu1 }
  0xe4   :  { %v341_v24 = vpop.f32.mrf.mxu0  ;;  %v347_v25 = vpop.f32.mrf.mxu1 }
  0xe5   :  { %v348_v26 = vadd.f32 %v347_v25, %v346_v23  ;;  %v342_v29 = vadd.f32 %v341_v24, %v340_v22 }
  0xe6   :  { %v343_v27 = vpop.f32.mrf.mxu0  ;;  %v349_v28 = vpop.f32.mrf.mxu1 }
  0xe7   :  { %v318_v30 = vpack.c.bf16 %v348_v26, %v348_v26  ;;  %v268_v34 = vmul.f32 %v342_v29, %v342_v29  ;;  %v270_v38 = vmul.f32 %v348_v26, %v348_v26 }
  0xe8   :  { %v344_v31 = vpop.f32.mrf.mxu0  ;;  %v350_v32 = vpop.f32.mrf.mxu1 }
  0xe9   :  { %255 = vst [vmem:[%s501_s2 + $0x8] sm:$0xf] %v318_v30  ;;  %v345_v33 = vadd.f32 %v344_v31, %v343_v27 }
  0xeb   :  { %v322_v35 = vpack.c.bf16 %v345_v33, %v342_v29  ;;  %v257_v36 = vadd.f32 %v345_v33, %v342_v29  ;;  %v269_v37 = vmul.f32 %v345_v33, %v345_v33 }
  0xed   :  { %323 = vst [vmem:[%s501_s2] sm:$0xff] %v322_v35   ;;  %v258_v39 = vadd.f32 %v348_v26, %v257_v36  ;;  %v271_v40 = vadd.f32 %v269_v37, %v268_v34 }
  0xef   :  { %v259_v41 = vrot.slane %v258_v39, 4  ;;  %v272_v42 = vadd.f32 %v271_v40, %v270_v38 }
  0xf1   :  { %v260_v43 = vadd.f32 %v259_v41, %v258_v39  ;;  %v273_v44 = vrot.slane %v272_v42, 4 }
  0xf3   :  { %v261_v45 = vrot.slane %v260_v43, 2  ;;  %v274_v46 = vadd.f32 %v273_v44, %v272_v42 }
  0xf5   :  { %v262_v47 = vadd.f32 %v261_v45, %v260_v43  ;;  %v275_v48 = vrot.slane %v274_v46, 2 }
  0xf7   :  { %v263_v49 = vrot.slane %v262_v47, 1  ;;  %v276_v50 = vadd.f32 %v275_v48, %v274_v46 }
  0xf9   :  { %v264_v52 = vadd.f32 %v263_v49, %v262_v47  ;;  %v277_v53 = vrot.slane %v276_v50, 1 }
  0xfb   :  { %v265_v55 = vadd.f32 %v264_v52, %v256_v51  ;;  %v278_v56 = vadd.f32 %v277_v53, %v276_v50 }
  0xfd   :  { %266 = vst [vmem:[%s499_s3] sm:$0x1] %v265_v55  ;;  %v279_v57 = vadd.f32 %v278_v56, %v267_v54 }
  0xff   :  { %280 = vst [vmem:[%s500_s4] sm:$0x1] %v279_v57 }

// kernel: _lambda_.11
= control target key start
LH: loop header
LB: loop body
LE: loop exit
PB: predicated region body
PF: predicated region fallthrough
CT: control target
= control target key end

     0   :  { %s332_s1 = inlined_call_operand.vmem [shape: bf16[256,128], index: 1, kind: input, shape index: {}]   ;;  %s333_s0 = inlined_call_operand.vmem [shape: bf16[8,256], index: 0, kind: input, shape index: {}]   ;;  %s334_s2 = inlined_call_operand.vmem [shape: f32[8,128], index: 2, kind: output, shape index: {}]  }
   0x1   :  { %v245_v0 = vld [vmem:[%s332_s1 + $0x78] sm:$0xff]   ;;  %v247_v2 = vld [vmem:[%s332_s1 + $0x70] sm:$0xff]   ;;  %v249_v4 = vld [vmem:[%s332_s1 + $0x68] sm:$0xff]  }
   0x2   :  { %v246_v1 = vld [vmem:[%s332_s1 + $0x38] sm:$0xff]   ;;  %223 = vmatprep.subr.bf16.mxu0 %v245_v0  ;;  %v248_v3 = vld [vmem:[%s332_s1 + $0x30] sm:$0xff]   ;;  %v250_v5 = vld [vmem:[%s332_s1 + $0x28] sm:$0xff]  }
   0x3   :  { %224 = vmatpush3.bf16.msra.mxu0 %v246_v1  ;;  %v251_v6 = vld [vmem:[%s332_s1 + $0x60] sm:$0xff]   ;;  %v253_v8 = vld [vmem:[%s332_s1 + $0x58] sm:$0xff]   ;;  %v255_v10 = vld [vmem:[%s332_s1 + $0x50] sm:$0xff]  }
   0x4   :  { %225 = vmatprep.subr.bf16.mxu0 %v247_v2  ;;  %v252_v7 = vld [vmem:[%s332_s1 + $0x20] sm:$0xff]   ;;  %v254_v9 = vld [vmem:[%s332_s1 + $0x18] sm:$0xff]   ;;  %v256_v13 = vld [vmem:[%s332_s1 + $0x10] sm:$0xff]  }
   0x5   :  { %v18_v11 = vld [vmem:[%s333_s0] sm:$0xff]  ;;  %v257_v14 = vld [vmem:[%s332_s1 + $0x48] sm:$0xff]  }
   0x6   :  { %v206_v12 = vcombine.high %v18_v11, %v18_v11  ;;  %v258_v15 = vld [vmem:[%s332_s1 + $0x8] sm:$0xff]   ;;  %v259_v16 = vld [vmem:[%s332_s1 + $0x40] sm:$0xff]   ;;  %v205_v18 = vcombine.low %v18_v11, %v18_v11 }
   0x7   :  { %226 = vmatpush3.bf16.msra.mxu0 %v248_v3  ;;  %v260_v17 = vld [vmem:[%s332_s1] sm:$0xff]  }
   0x8   :  { %227 = vmatprep.subr.bf16.mxu0 %v249_v4  ;;  %186 = vmatprep.mubr.bf16.mxu0 %v206_v12 }
   0xb   :  { %228 = vmatpush3.bf16.msra.mxu0 %v250_v5 }
   0xc   :  { %229 = vmatprep.subr.bf16.mxu0 %v251_v6 }
   0xf   :  { %230 = vmatpush3.bf16.msra.mxu0 %v252_v7 }
  0x10   :  { %231 = vmatprep.subr.bf16.mxu0 %v253_v8 }
  0x13   :  { %232 = vmatpush3.bf16.msra.mxu0 %v254_v9 }
  0x14   :  { %233 = vmatprep.subr.bf16.mxu0 %v255_v10 }
  0x17   :  { %234 = vmatpush3.bf16.msra.mxu0 %v256_v13 }
  0x18   :  { %235 = vmatprep.subr.bf16.mxu0 %v257_v14 }
  0x1b   :  { %236 = vmatpush3.bf16.msra.mxu0 %v258_v15 }
  0x1c   :  { %237 = vmatprep.subr.bf16.mxu0 %v259_v16 }
  0x1f   :  { %238 = vmatpush3.bf16.msra.mxu0 %v260_v17 }
  0x22   :  { %187 = vmatmul.mubr.bf16.vlgmr.msra.gmra.mxu0 %v205_v18 }
  0xe2   :  { %v239_v19 = vpop.f32.mrf.mxu0 }
  0xe4   :  { %v240_v20 = vpop.f32.mrf.mxu0 }
  0xe5   :  { %v241_v21 = vadd.f32 %v240_v20, %v239_v19 }
  0xe6   :  { %v242_v22 = vpop.f32.mrf.mxu0 }
  0xe7   :  { %200 = vst [vmem:[%s334_s2] sm:$0xff] %v241_v21 }
  0xe8   :  { %v243_v23 = vpop.f32.mrf.mxu0 }

</bundles_post_ra>
